<compile_context>
chip_gen: v6e
topology: v6e:2x2x1
jax: 0.10.0
libtpu: 0.0.40
codegen_flags: <defaults>
</compile_context>

<pallas_src>
import functools

import jax
import jax.numpy as jnp
from jax.experimental import pallas as pl
from jax.experimental.pallas import tpu as pltpu


def _round_up(x, m):
    return (x + m - 1) // m * m


def _vmem_capacity_bytes():
    try:
        return int(pltpu.get_tpu_info().vmem_capacity_bytes)
    except Exception:  # not on TPU / API unavailable: assume the smallest (v7x)
        return 64 << 20


def _pick_block_rows(b, c, in_bytes, vmem_capacity):
    """VMEM-budget-aware batch tile, multiple of 8, >=4 grid blocks if possible."""
    # ~1/4 of physical VMEM for this kernel's working set (v7x: 16 MiB,
    # v5e/v6e: 24 MiB capped).
    budget = max(4 << 20, min(24 << 20, vmem_capacity // 4))
    # Per-row cost: 3 double-buffered input tiles + ~6 live f32 (bb, C) temps.
    per_row = c * (3 * 2 * in_bytes + 6 * 4)
    bb = budget // max(per_row, 1)
    bb = max(8, min(1024, bb))
    bb = (bb // 8) * 8
    # Keep >= ~4 grid blocks so both v7x TensorCores (and the pipeline) have work.
    bb = min(bb, max(8, _round_up(pl.cdiv(b, 4), 8)))
    return max(8, bb)


def _cfvqa_introd_kernel(la_ref, lt_ref, ls_ref, cid_ref, out_ref, *,
                         true_rows, block_rows):
    """Per-block partial sum of the IntroD per-sample loss.

    la/lt/ls: (bb, C) logits (all / teacher / student), any float dtype.
    cid     : (bb, 1) int32 class ids.
    out     : (1, 8, 128) f32; every element holds this block's partial sum.
    """
    i = pl.program_id(0)
    cid = cid_ref[...]                                            # (bb, 1) int32
    bb, c = ls_ref.shape

    lane = jax.lax.broadcasted_iota(jnp.int32, (bb, c), 1)
    sel = lane == cid                                             # one-hot mask

    def ce_stats(x):
        # Per-row: max, exp(x-max), sum, log-sum-exp, CE = (max+lse) - x[cid].
        m = jnp.max(x, axis=-1, keepdims=True)
        e = jnp.exp(x - m)
        s = jnp.sum(e, axis=-1, keepdims=True)
        lse = jnp.log(s)
        g = jnp.sum(jnp.where(sel, x, 0.0), axis=-1, keepdims=True)
        return m, e, s, lse, (m + lse) - g

    # Stage 1: 'all' logits -> CE_id only; la dies afterwards.
    la = la_ref[...].astype(jnp.float32)
    _, _, _, _, ce_id = ce_stats(la)
    del la

    # Stage 2: student logits -> CE_s, (m_s + lse_s); ls stays live for kd.
    ls = ls_ref[...].astype(jnp.float32)
    m_s, _, _, lse_s, ce_s = ce_stats(ls)

    # Stage 3: teacher logits -> CE_t and the kd cross term, without
    # materializing p_t:
    #   kd = -sum(softmax(lt) * log_softmax(ls))
    #      = (m_s + lse_s) - sum(exp(lt - m_t) * ls) / sum(exp(lt - m_t))
    lt = lt_ref[...].astype(jnp.float32)
    _, e_t, s_t, _, ce_t = ce_stats(lt)
    cross = jnp.sum(e_t * ls, axis=-1, keepdims=True) * pl.reciprocal(
        s_t, approx=False)
    kd = (m_s + lse_s) - cross                                    # (bb, 1)

    # weight = CE_t / (CE_t + CE_a); detached in the forward pass.
    # NOTE: same 0/0 hazard as the PyTorch reference if both CEs are 0.
    weight = ce_t / (ce_t + ce_id)
    per_sample = weight * kd + (1.0 - weight) * ce_s              # (bb, 1)

    # Mask rows beyond the true batch (partial edge block reads stale VMEM)
    # and emit a single per-block partial sum.
    row = i * block_rows + jax.lax.broadcasted_iota(jnp.int32, (bb, 1), 0)
    valid = row < true_rows
    block_sum = jnp.sum(jnp.where(valid, per_sample, 0.0))
    out_ref[...] = jnp.broadcast_to(block_sum.astype(jnp.float32), out_ref.shape)


def cfvqa_introd_criterion(net_out, batch, *, input_dtype=jnp.bfloat16,
                           block_rows=None):
    """JAX/Pallas equivalent of CFVQAIntroDCriterion.forward (loss only)."""
    logits_all = net_out['logits_all']
    logits_t = net_out['logits_cfvqa']
    logits_s = net_out['logits_stu']
    class_id = batch['class_id']

    b, c = logits_s.shape
    cid = class_id.reshape(b, 1).astype(jnp.int32)                # squeeze(1)

    # Feed narrow inputs to this mem-bound kernel (halves HBM reads); the
    # kernel upcasts to f32. Ideally the producer already emits `input_dtype`
    # so the cast below is a no-op that fuses away.
    def maybe_cast(x):
        if input_dtype is None or x.dtype == input_dtype:
            return x
        return x.astype(input_dtype)

    la, lt, ls = maybe_cast(logits_all), maybe_cast(logits_t), maybe_cast(logits_s)

    in_bytes = jnp.dtype(ls.dtype).itemsize
    vmem_cap = _vmem_capacity_bytes()
    bb = block_rows if block_rows is not None else _pick_block_rows(
        b, c, in_bytes, vmem_cap)
    n_blocks = pl.cdiv(b, bb)

    kernel = functools.partial(_cfvqa_introd_kernel, true_rows=b, block_rows=bb)

    partials = pl.pallas_call(
        kernel,
        out_shape=jax.ShapeDtypeStruct((n_blocks, 8, 128), jnp.float32),
        grid=(n_blocks,),
        in_specs=[
            pl.BlockSpec((bb, c), lambda i: (i, 0)),   # full-extent class dim
            pl.BlockSpec((bb, c), lambda i: (i, 0)),
            pl.BlockSpec((bb, c), lambda i: (i, 0)),
            pl.BlockSpec((bb, 1), lambda i: (i, 0)),
        ],
        out_specs=pl.BlockSpec((1, 8, 128), lambda i: (i, 0, 0)),
        compiler_params=pltpu.CompilerParams(
            dimension_semantics=("parallel",),
            vmem_limit_bytes=int(min(64 << 20, vmem_cap // 2)),
        ),
    )(la, lt, ls, cid)

    # Tiny finish in XLA: mean over the true batch (sum of per-block sums / B).
    loss = jnp.sum(partials[:, 0, 0]) / b
    return {'loss': loss}


def _reference(net_out, batch):
    """Pure-JAX reference mirroring the PyTorch module (f32 math)."""
    la = net_out['logits_all'].astype(jnp.float32)
    lt = net_out['logits_cfvqa'].astype(jnp.float32)
    ls = net_out['logits_stu'].astype(jnp.float32)
    cid = batch['class_id'].reshape(-1)

    p_t = jax.nn.softmax(lt, -1)
    kd = -jnp.sum(p_t * jax.nn.log_softmax(ls, -1), axis=1)
    ce = lambda lg: -jnp.take_along_axis(
        jax.nn.log_softmax(lg, -1), cid[:, None], axis=1)[:, 0]
    cls_s, cls_t, cls_a = ce(ls), ce(lt), ce(la)
    w = cls_t / (cls_t + cls_a)
    return jnp.mean(w * kd) + jnp.mean((1 - w) * cls_s)


if __name__ == "__main__":
    key = jax.random.PRNGKey(0)
    # Small, deliberately non-aligned shapes: exercises the full-extent class
    # BlockSpec (C % 128 != 0) and the partial batch block (B % 8 != 0).
    B, C = 6, 200
    k1, k2, k3, k4 = jax.random.split(key, 4)

    # Producer emits bf16 (what the kernel is optimized for); the reference is
    # run on the same bf16-rounded values so the comparison is apples-to-apples.
    net_out = {
        'logits_all':   jax.random.normal(k1, (B, C), dtype=jnp.float32).astype(jnp.bfloat16),
        'logits_cfvqa': jax.random.normal(k2, (B, C), dtype=jnp.float32).astype(jnp.bfloat16),
        'logits_stu':   jax.random.normal(k3, (B, C), dtype=jnp.float32).astype(jnp.bfloat16),
    }
    batch = {
        'class_id': jax.random.randint(k4, (B, 1), 0, C, dtype=jnp.int32),
    }

    out = cfvqa_introd_criterion(net_out, batch)
    loss = jax.block_until_ready(out['loss'])

    ref = jax.block_until_ready(_reference(net_out, batch))
    assert jnp.isfinite(loss), loss
    assert jnp.allclose(loss, ref, atol=2e-5, rtol=2e-5), (loss, ref)

    print("KERNEL_OK")
</pallas_src>

<mosaic_0001>
module attributes {stable_mosaic.version = 11 : i64} {
  func.func @_cfvqa_introd_kernel(%arg0: i32, %arg1: memref<8x200xbf16, #tpu.memory_space<vmem>>, %arg2: memref<8x200xbf16, #tpu.memory_space<vmem>>, %arg3: memref<8x200xbf16, #tpu.memory_space<vmem>>, %arg4: memref<8x1xi32, #tpu.memory_space<vmem>>, %arg5: memref<1x8x128xf32, #tpu.memory_space<vmem>>) attributes {dimension_semantics = [#tpu.dimension_semantics<parallel>], iteration_bounds = array<i64: 1>, scalar_prefetch = 0 : i64, scratch_operands = 0 : i64, tpu.core_type = #tpu.core_type<tc>, window_params = [{transform_indices = @transform_0, window_bounds = array<i64: 8, 200>}, {transform_indices = @transform_1, window_bounds = array<i64: 8, 200>}, {transform_indices = @transform_2, window_bounds = array<i64: 8, 200>}, {transform_indices = @transform_3, window_bounds = array<i64: 8, 1>}, {transform_indices = @transform_4, window_bounds = array<i64: 1, 8, 128>}]} {
    %c0 = arith.constant 0 : index
    %c0_0 = arith.constant 0 : index
    %0 = vector.load %arg4[%c0, %c0_0] : memref<8x1xi32, #tpu.memory_space<vmem>>, vector<8x1xi32>
    %1 = tpu.iota {dimensions = array<i32: 1>} : vector<8x200xi32>
    %2 = vector.broadcast %0 : vector<8x1xi32> to vector<8x200xi32>
    %3 = arith.cmpi eq, %1, %2 : vector<8x200xi32>
    %c0_1 = arith.constant 0 : index
    %c0_2 = arith.constant 0 : index
    %4 = vector.load %arg1[%c0_1, %c0_2] : memref<8x200xbf16, #tpu.memory_space<vmem>>, vector<8x200xbf16>
    %5 = arith.extf %4 : vector<8x200xbf16> to vector<8x200xf32>
    %cst = arith.constant dense<0xFF800000> : vector<8xf32>
    %6 = vector.multi_reduction <maximumf>, %5, %cst [1] : vector<8x200xf32> to vector<8xf32>
    %7 = vector.shape_cast %6 : vector<8xf32> to vector<8x1xf32>
    %8 = vector.broadcast %7 : vector<8x1xf32> to vector<8x200xf32>
    %9 = arith.subf %5, %8 : vector<8x200xf32>
    %10 = math.exp %9 : vector<8x200xf32>
    %cst_3 = arith.constant dense<0.000000e+00> : vector<8xf32>
    %11 = vector.multi_reduction <add>, %10, %cst_3 [1] : vector<8x200xf32> to vector<8xf32>
    %12 = vector.shape_cast %11 : vector<8xf32> to vector<8x1xf32>
    %13 = math.log %12 : vector<8x1xf32>
    %cst_4 = arith.constant 0.000000e+00 : f32
    %14 = vector.broadcast %cst_4 : f32 to vector<8x200xf32>
    %15 = arith.select %3, %5, %14 : vector<8x200xi1>, vector<8x200xf32>
    %cst_5 = arith.constant dense<0.000000e+00> : vector<8xf32>
    %16 = vector.multi_reduction <add>, %15, %cst_5 [1] : vector<8x200xf32> to vector<8xf32>
    %17 = vector.shape_cast %16 : vector<8xf32> to vector<8x1xf32>
    %18 = arith.addf %7, %13 : vector<8x1xf32>
    %19 = arith.subf %18, %17 : vector<8x1xf32>
    %c0_6 = arith.constant 0 : index
    %c0_7 = arith.constant 0 : index
    %20 = vector.load %arg3[%c0_6, %c0_7] : memref<8x200xbf16, #tpu.memory_space<vmem>>, vector<8x200xbf16>
    %21 = arith.extf %20 : vector<8x200xbf16> to vector<8x200xf32>
    %cst_8 = arith.constant dense<0xFF800000> : vector<8xf32>
    %22 = vector.multi_reduction <maximumf>, %21, %cst_8 [1] : vector<8x200xf32> to vector<8xf32>
    %23 = vector.shape_cast %22 : vector<8xf32> to vector<8x1xf32>
    %24 = vector.broadcast %23 : vector<8x1xf32> to vector<8x200xf32>
    %25 = arith.subf %21, %24 : vector<8x200xf32>
    %26 = math.exp %25 : vector<8x200xf32>
    %cst_9 = arith.constant dense<0.000000e+00> : vector<8xf32>
    %27 = vector.multi_reduction <add>, %26, %cst_9 [1] : vector<8x200xf32> to vector<8xf32>
    %28 = vector.shape_cast %27 : vector<8xf32> to vector<8x1xf32>
    %29 = math.log %28 : vector<8x1xf32>
    %cst_10 = arith.constant 0.000000e+00 : f32
    %30 = vector.broadcast %cst_10 : f32 to vector<8x200xf32>
    %31 = arith.select %3, %21, %30 : vector<8x200xi1>, vector<8x200xf32>
    %cst_11 = arith.constant dense<0.000000e+00> : vector<8xf32>
    %32 = vector.multi_reduction <add>, %31, %cst_11 [1] : vector<8x200xf32> to vector<8xf32>
    %33 = vector.shape_cast %32 : vector<8xf32> to vector<8x1xf32>
    %34 = arith.addf %23, %29 : vector<8x1xf32>
    %35 = arith.subf %34, %33 : vector<8x1xf32>
    %c0_12 = arith.constant 0 : index
    %c0_13 = arith.constant 0 : index
    %36 = vector.load %arg2[%c0_12, %c0_13] : memref<8x200xbf16, #tpu.memory_space<vmem>>, vector<8x200xbf16>
    %37 = arith.extf %36 : vector<8x200xbf16> to vector<8x200xf32>
    %cst_14 = arith.constant dense<0xFF800000> : vector<8xf32>
    %38 = vector.multi_reduction <maximumf>, %37, %cst_14 [1] : vector<8x200xf32> to vector<8xf32>
    %39 = vector.shape_cast %38 : vector<8xf32> to vector<8x1xf32>
    %40 = vector.broadcast %39 : vector<8x1xf32> to vector<8x200xf32>
    %41 = arith.subf %37, %40 : vector<8x200xf32>
    %42 = math.exp %41 : vector<8x200xf32>
    %cst_15 = arith.constant dense<0.000000e+00> : vector<8xf32>
    %43 = vector.multi_reduction <add>, %42, %cst_15 [1] : vector<8x200xf32> to vector<8xf32>
    %44 = vector.shape_cast %43 : vector<8xf32> to vector<8x1xf32>
    %45 = math.log %44 : vector<8x1xf32>
    %cst_16 = arith.constant 0.000000e+00 : f32
    %46 = vector.broadcast %cst_16 : f32 to vector<8x200xf32>
    %47 = arith.select %3, %37, %46 : vector<8x200xi1>, vector<8x200xf32>
    %cst_17 = arith.constant dense<0.000000e+00> : vector<8xf32>
    %48 = vector.multi_reduction <add>, %47, %cst_17 [1] : vector<8x200xf32> to vector<8xf32>
    %49 = vector.shape_cast %48 : vector<8xf32> to vector<8x1xf32>
    %50 = arith.addf %39, %45 : vector<8x1xf32>
    %51 = arith.subf %50, %49 : vector<8x1xf32>
    %52 = arith.mulf %42, %21 : vector<8x200xf32>
    %cst_18 = arith.constant dense<0.000000e+00> : vector<8xf32>
    %53 = vector.multi_reduction <add>, %52, %cst_18 [1] : vector<8x200xf32> to vector<8xf32>
    %54 = vector.shape_cast %53 : vector<8xf32> to vector<8x1xf32>
    %55 = tpu.reciprocal %44 : vector<8x1xf32> -> vector<8x1xf32>
    %56 = arith.mulf %54, %55 : vector<8x1xf32>
    %57 = arith.addf %23, %29 : vector<8x1xf32>
    %58 = arith.subf %57, %56 : vector<8x1xf32>
    %59 = arith.addf %51, %19 : vector<8x1xf32>
    %60 = arith.divf %51, %59 : vector<8x1xf32>
    %61 = arith.mulf %60, %58 : vector<8x1xf32>
    %cst_19 = arith.constant 1.000000e+00 : f32
    %62 = vector.broadcast %cst_19 : f32 to vector<8x1xf32>
    %63 = arith.subf %62, %60 : vector<8x1xf32>
    %64 = arith.mulf %63, %35 : vector<8x1xf32>
    %65 = arith.addf %61, %64 : vector<8x1xf32>
    %c8_i32 = arith.constant 8 : i32
    %66 = arith.muli %arg0, %c8_i32 : i32
    %67 = tpu.iota {dimensions = array<i32: 0>} : vector<8x1xi32>
    %68 = vector.broadcast %66 : i32 to vector<8x1xi32>
    %69 = arith.addi %68, %67 : vector<8x1xi32>
    %c6_i32 = arith.constant 6 : i32
    %70 = vector.broadcast %c6_i32 : i32 to vector<8x1xi32>
    %71 = arith.cmpi slt, %69, %70 : vector<8x1xi32>
    %cst_20 = arith.constant 0.000000e+00 : f32
    %72 = vector.broadcast %cst_20 : f32 to vector<8x1xf32>
    %73 = arith.select %71, %65, %72 : vector<8x1xi1>, vector<8x1xf32>
    %74 = vector.shape_cast %73 : vector<8x1xf32> to vector<1x8x1xf32>
    %cst_21 = arith.constant dense<0.000000e+00> : vector<1xf32>
    %75 = vector.multi_reduction <add>, %74, %cst_21 [1, 2] : vector<1x8x1xf32> to vector<1xf32>
    %76 = vector.shape_cast %75 : vector<1xf32> to vector<1x1x1xf32>
    %77 = vector.extract %76[0, 0, 0] : f32 from vector<1x1x1xf32>
    %78 = vector.broadcast %77 : f32 to vector<1x8x128xf32>
    %c0_22 = arith.constant 0 : index
    %c0_23 = arith.constant 0 : index
    %c0_24 = arith.constant 0 : index
    %79 = vector.load %arg5[%c0_22, %c0_23, %c0_24] : memref<1x8x128xf32, #tpu.memory_space<vmem>>, vector<1x8x128xf32>
    tpu.vector_store %arg5[%c0_22, %c0_23, %c0_24], %78 {strides = array<i32>} : memref<1x8x128xf32, #tpu.memory_space<vmem>>, vector<1x8x128xf32>,
    return
  }
  func.func @transform_0(%arg0: i32) -> (i32, i32) {
    %c0_i32 = arith.constant 0 : i32
    %c0_i32_0 = arith.constant 0 : i32
    return %arg0, %c0_i32 : i32, i32
  }
  func.func @transform_1(%arg0: i32) -> (i32, i32) {
    %c0_i32 = arith.constant 0 : i32
    %c0_i32_0 = arith.constant 0 : i32
    return %arg0, %c0_i32 : i32, i32
  }
  func.func @transform_2(%arg0: i32) -> (i32, i32) {
    %c0_i32 = arith.constant 0 : i32
    %c0_i32_0 = arith.constant 0 : i32
    return %arg0, %c0_i32 : i32, i32
  }
  func.func @transform_3(%arg0: i32) -> (i32, i32) {
    %c0_i32 = arith.constant 0 : i32
    %c0_i32_0 = arith.constant 0 : i32
    return %arg0, %c0_i32 : i32, i32
  }
  func.func @transform_4(%arg0: i32) -> (i32, i32, i32) {
    %c0_i32 = arith.constant 0 : i32
    %c0_i32_0 = arith.constant 0 : i32
    %c0_i32_1 = arith.constant 0 : i32
    return %arg0, %c0_i32, %c0_i32_0 : i32, i32, i32
  }
}

</mosaic_0001>

<bundles_post_ra>
// kernel: tpu_custom_call.1
= control target key start
LH: loop header
LB: loop body
LE: loop exit
PB: predicated region body
PF: predicated region fallthrough
CT: control target
= control target key end

     0   :  { %9 = vsyncpa [#allocation3], 0  ;;  %s370_s0 = inlined_call_operand.vmem [shape: bf16[6,200], index: 0, kind: input, shape index: {}]   ;;  %s371_s1 = inlined_call_operand.hbm [shape: bf16[6,200], index: 1, kind: input, shape index: {}]   ;;  %s372_s2 = inlined_call_operand.hbm [shape: bf16[6,200], index: 2, kind: input, shape index: {}]   ;;  %s373_s3 = inlined_call_operand.vmem [shape: s32[6,1], index: 3, kind: input, shape index: {}]   ;;  %s374_s4 = inlined_call_operand.hbm [shape: f32[1,8,128], index: 4, kind: output, shape index: {}]  }
   0x1   :  { %10 = vsyncpa [#allocation6], 0 }
   0x2   :  { %11 = vsyncpa [#allocation4], 0  ;;  %s281_s15 = smov [#allocation2]   ;;  %s282_s17 = smov [#allocation5]  }
   0x3   :  { %s20_s16 = sshll.u32 %s281_s15, 4  ;;  %s30_s18 = sshll.u32 %s282_s17, 4  ;;  %s21_s16 = int_to_ptr.vmem [resolvable:$true] %s20_s16  ;;  %s31_s18 = int_to_ptr.vmem [resolvable:$true] %s30_s18 }
   0x4   :  { %s223_s19 = scalar_lea.vmem %s21_s16, 128  ;;  %p228_p1 = scmp.lt.s32.totalorder %s21_s16, %s21_s16 }
   0x5   :  { %p224_p0 = scmp.ne.s32.totalorder %s21_s16, %s223_s19  ;;  %p229_p2 = scmp.lt.s32.totalorder %s223_s19, %s223_s19 }
   0x7   :  { %p230_p3 = por %p229_p2, %p228_p1 }
   0x9   :  { %p231_p4 = pnand %p230_p3, %p224_p0 }
   0xb   :  { %234 = shalt.err (!%p231_p4)
}
   0xc   :  { %23 = dma.hbm_to_vmem [thread:$0]  %s371_s1, 128, %s21_s16, [#allocation3]  }
   0xd   :  { %s243_s22 = scalar_lea.vmem %s31_s18, 128  ;;  %p248_p6 = scmp.lt.s32.totalorder %s31_s18, %s31_s18 }
   0xe   :  { %p244_p5 = scmp.ne.s32.totalorder %s31_s18, %s243_s22  ;;  %p249_p7 = scmp.lt.s32.totalorder %s243_s22, %s243_s22 }
  0x10   :  { %p250_p8 = por %p249_p7, %p248_p6 }
  0x12   :  { %p251_p9 = pnand %p250_p8, %p244_p5 }
  0x14   :  { %254 = shalt.err (!%p251_p9)
}
  0x15   :  { %33 = dma.hbm_to_vmem [thread:$0]  %s372_s2, 128, %s31_s18, [#allocation6]  }
  0x16   :  { %275 = dma.done.wait [#allocation3], 128  }
  0x17   :  { %276 = vsyncadd [#allocation3], 4294967168 }
  0x18   :  { %277 = dma.done.wait [#allocation6], 128  }
  0x19   :  { %278 = vsyncadd [#allocation6], 4294967168  ;;  %v283_v0 = vmov 0   ;;  %vm54_vm0 = vcmask 588800   ;;  %v79_v1 = vld [vmem:[#allocation5] sm:$0xff]  ;;  %v51_v2 = vld [vmem:[%s370_s0] sm:$0xff]  ;;  %v43_v32 = vlaneseq }
  0x1a   :  { %191 = vset.pattern.permute.xlu1 %v283_v0  ;;  %192 = vset.pattern.permute.xlu0 %v283_v0  ;;  %v106_v3 = vld [vmem:[#allocation2] sm:$0xff]  ;;  %v319_v4 = vunpack.c.l.bf16 %v79_v1  ;;  %v321_v5 = vunpack.c.h.bf16 %v79_v1  ;;  %v52_v6 = vunpack.c.l.bf16 %v51_v2  ;;  %v53_v7 = vunpack.c.h.bf16 %v51_v2 }
  0x1b   :  { %v107_v8 = vunpack.c.l.bf16 %v106_v3  ;;  %v108_v9 = vunpack.c.h.bf16 %v106_v3  ;;  %v42_v16 = vld [vmem:[%s373_s3] sm:$0xff]  ;;  %v44_v33 = vand.u32 127, %v43_v32  ;;  %vm156_vm4 = vcmask 7168   ;;  %s284_s3 = smov [#allocation7]  }
  0x1c   :  { %v82_v10 = vsel %vm54_vm0, %v321_v5, -inf  ;;  %v55_v11 = vsel %vm54_vm0, %v53_v7, -inf  ;;  %s175_s26 = sshll.u32 %s284_s3, 4  ;;  %s176_s26 = int_to_ptr.vmem [resolvable:$true] %s175_s26 }
  0x1d   :  { %v83_v12 = vmax.f32 %v319_v4, %v82_v10  ;;  %v56_v13 = vmax.f32 %v52_v6, %v55_v11  ;;  %v109_v14 = vsel %vm54_vm0, %v108_v9, -inf  ;;  %v45_v34 = vadd.s32 128, %v44_v33  ;;  %s255_s28 = scalar_lea.vmem %s176_s26, 128  ;;  %p260_p11 = scmp.lt.s32.totalorder %s176_s26, %s176_s26 }
  0x1e   :  { %v110_v15 = vmax.f32 %v107_v8, %v109_v14  ;;  %p256_p10 = scmp.ne.s32.totalorder %s176_s26, %s255_s28  ;;  %p261_p12 = scmp.lt.s32.totalorder %s255_s28, %s255_s28 }
  0x1f   :  { %84 = vmax.xlane.f32.xlu1 %v83_v12  ;;  %57 = vmax.xlane.f32.xlu0 %v56_v13 }
  0x20   :  { %p262_p13 = por %p261_p12, %p260_p11 }
  0x22   :  { %p263_p0 = pnand %p262_p13, %p256_p10 }
  0x23   :  { %111 = vmax.xlane.f32.xlu0 %v110_v15 }
  0x30   :  { %47 = vperm.xlu1 %191, %v42_v16  }
  0xa8   :  { %v331_v17 = vpop.xlane.xlu1 %84  ;;  %v333_v18 = vpop.xlane.xlu0 %57 }
  0xa9   :  { %v86_v19 = vsub.f32 %v319_v4, %v331_v17  ;;  %v87_v20 = vsub.f32 %v321_v5, %v331_v17  ;;  %v59_v21 = vsub.f32 %v52_v6, %v333_v18  ;;  %v60_v22 = vsub.f32 %v53_v7, %v333_v18 }
  0xab   :  { %v88_v23 = vmul.f32 1.442695, %v86_v19  ;;  %v90_v24 = vmul.f32 1.442695, %v87_v20  ;;  %v61_v25 = vmul.f32 1.442695, %v59_v21 }
  0xac   :  { %v63_v26 = vmul.f32 1.442695, %v60_v22  ;;  %v341_v27 = vpop.xlane.xlu0 %111  ;;  %v48_v35 = vpop.permute.xlu1 %47 }
  0xad   :  { %193 = vpow2.f32 %v88_v23  ;;  %v113_v28 = vsub.f32 %v107_v8, %v341_v27  ;;  %v114_v29 = vsub.f32 %v108_v9, %v341_v27  ;;  %vm50_vm1 = vcmp.eq.s32.totalorder %v45_v34, %v48_v35 }
  0xae   :  { %195 = vpow2.f32 %v90_v24  ;;  %vm49_vm2 = vcmp.eq.s32.totalorder %v44_v33, %v48_v35  ;;  %v72_v46 = vsel %vm50_vm1, %v53_v7, 0.0  ;;  %v126_v51 = vsel %vm50_vm1, %v108_v9, 0.0 }
  0xaf   :  { %197 = vpow2.f32 %v61_v25  ;;  %v115_v30 = vmul.f32 1.442695, %v113_v28  ;;  %v117_v31 = vmul.f32 1.442695, %v114_v29  ;;  %v71_v49 = vsel %vm49_vm2, %v52_v6, 0.0 }
  0xb0   :  { %199 = vpow2.f32 %v63_v26  ;;  %v73_v50 = vsel %vm54_vm0, %v72_v46, 0.0  ;;  %v125_v53 = vsel %vm49_vm2, %v107_v8, 0.0  ;;  %v127_v54 = vsel %vm54_vm0, %v126_v51, 0.0 }
  0xb1   :  { %201 = vpow2.f32 %v115_v30  ;;  %v74_v52 = vadd.f32 %v73_v50, %v71_v49  ;;  %v128_v56 = vadd.f32 %v127_v54, %v125_v53  ;;  %v99_v59 = vsel %vm50_vm1, %v321_v5, 0.0 }
  0xb2   :  { %203 = vpow2.f32 %v117_v31  ;;  %v98_v61 = vsel %vm49_vm2, %v319_v4, 0.0  ;;  %v100_v62 = vsel %vm54_vm0, %v99_v59, 0.0  ;;  %v151_v24 = vshrl.u32 %v43_v32, 7 }
  0xb3   :  { %v101_v63 = vadd.f32 %v100_v62, %v98_v61 }
  0xb4   :  { %vm154_vm3 = vcmp.lt.s32.totalorder %v151_v24, 6 }
  0xba   :  { %v194_v36 = vpop.eup %193 }
  0xbb   :  { %v196_v37 = vpop.eup %195 }
  0xbc   :  { %v198_v38 = vpop.eup %197  ;;  %v92_v39 = vsel %vm54_vm0, %v196_v37, 0.0 }
  0xbd   :  { %v200_v40 = vpop.eup %199  ;;  %v93_v41 = vadd.f32 %v194_v36, %v92_v39 }
  0xbe   :  { %v202_v42 = vpop.eup %201  ;;  %v65_v43 = vsel %vm54_vm0, %v200_v40, 0.0 }
  0xbf   :  { %v204_v44 = vpop.eup %203  ;;  %v66_v45 = vadd.f32 %v198_v38, %v65_v43  ;;  %94 = vadd.xlane.f32.xlu1 %v93_v41  ;;  %v133_v57 = vmul.f32 %v202_v42, %v319_v4 }
  0xc0   :  { %v119_v47 = vsel %vm54_vm0, %v204_v44, 0.0  ;;  %v134_v55 = vmul.f32 %v204_v44, %v321_v5 }
  0xc1   :  { %67 = vadd.xlane.f32.xlu0 %v66_v45  ;;  %v120_v48 = vadd.f32 %v202_v42, %v119_v47 }
  0xc2   :  { %v135_v58 = vsel %vm54_vm0, %v134_v55, 0.0 }
  0xc3   :  { %v136_v60 = vadd.f32 %v135_v58, %v133_v57 }
  0xc5   :  { %121 = vadd.xlane.f32.xlu0 %v120_v48 }
  0xc9   :  { %75 = vadd.xlane.f32.xlu0 %v74_v52 }
  0xcd   :  { %129 = vadd.xlane.f32.xlu0 %v128_v56 }
  0xd1   :  { %137 = vadd.xlane.f32.xlu0 %v136_v60 }
  0xd5   :  { %102 = vadd.xlane.f32.xlu0 %v101_v63 }
 0x148   :  { %v95_v8 = vpop.xlane.xlu1 %94 }
 0x14a   :  { %v68_v0 = vpop.xlane.xlu0 %67 }
 0x14b   :  { %205 = vlog2.f32 %v68_v0 }
 0x14e   :  { %v122_v1 = vpop.xlane.xlu0 %121 }
 0x14f   :  { %207 = vlog2.f32 %v122_v1 }
 0x150   :  { %209 = vlog2.f32 %v95_v8 }
 0x151   :  { %211 = vrcp.f32 %v122_v1 }
 0x152   :  { %v76_v6 = vpop.xlane.xlu0 %75 }
 0x156   :  { %v130_v10 = vpop.xlane.xlu0 %129 }
 0x158   :  { %v206_v2 = vpop.eup %205 }
 0x159   :  { %v70_v3 = vmul.f32 0.6931472, %v206_v2 }
 0x15a   :  { %v138_v15 = vpop.xlane.xlu0 %137 }
 0x15b   :  { %v77_v5 = vadd.f32 %v70_v3, %v333_v18 }
 0x15c   :  { %v208_v7 = vpop.eup %207 }
 0x15d   :  { %v124_v9 = vmul.f32 0.6931472, %v208_v7  ;;  %v78_v11 = vsub.f32 %v77_v5, %v76_v6  ;;  %v210_v14 = vpop.eup %209 }
 0x15e   :  { %v212_v16 = vpop.eup %211  ;;  %v97_v19 = vmul.f32 0.6931472, %v210_v14  ;;  %v103_v22 = vpop.xlane.xlu0 %102 }
 0x15f   :  { %v131_v4 = vadd.f32 %v124_v9, %v341_v27  ;;  %v140_v20 = vmul.f32 %v212_v16, %v138_v15 }
 0x160   :  { %v104_v18 = vadd.f32 %v97_v19, %v331_v17 }
 0x161   :  { %v132_v12 = vsub.f32 %v131_v4, %v130_v10 }
 0x162   :  { %v141_v25 = vsub.f32 %v104_v18, %v140_v20  ;;  %v105_v27 = vsub.f32 %v104_v18, %v103_v22 }
 0x163   :  { %v142_v13 = vadd.f32 %v132_v12, %v78_v11 }
 0x165   :  { %213 = vrcp.f32 %v142_v13 }
 0x172   :  { %v214_v21 = vpop.eup %213 }
 0x173   :  { %v144_v23 = vmul.f32 %v214_v21, %v132_v12 }
 0x175   :  { %v146_v26 = vsub.f32 1.0, %v144_v23  ;;  %v145_v28 = vmul.f32 %v144_v23, %v141_v25 }
 0x177   :  { %v147_v29 = vmul.f32 %v146_v26, %v105_v27 }
 0x179   :  { %v148_v30 = vadd.f32 %v147_v29, %v145_v28 }
 0x17b   :  { %v155_v31 = vsel %vm154_vm3, %v148_v30, 0.0 }
 0x17c   :  { %v157_v33 = vsel %vm156_vm4, %v155_v31, 0.0 }
 0x17d   :  { %158 = vadd.xlane.f32.xlu0 %v157_v33 }
 0x206   :  { %v159_v34 = vpop.xlane.xlu0 %158 }
 0x207   :  { %v160_v35 = vrot.slane %v159_v34, 4 }
 0x209   :  { %v161_v36 = vadd.f32 %v160_v35, %v159_v34 }
 0x20b   :  { %v162_v37 = vrot.slane %v161_v36, 2 }
 0x20d   :  { %v163_v38 = vadd.f32 %v162_v37, %v161_v36 }
 0x20f   :  { %v164_v39 = vrot.slane %v163_v38, 1 }
 0x211   :  { %v165_v17 = vadd.f32 %v164_v39, %v163_v38 }
 0x213   :  { %185 = vpush %v165_v17 }
 0x244   :  { %s186_s27 = spop %185 }
 0x245   :  { %v167_v32 = vstv %s186_s27 }
 0x246   :  { %168 = vst [vmem:[#allocation7] sm:$0xff] %v167_v32 }
 0x247   :  { %266 = shalt.err (!%p263_p0)
}
 0x248   :  { %178 = dma.vmem_to_hbm [thread:$0]  %s176_s26, 128, %s374_s4, [#allocation4]  }
 0x249   :  { %279 = dma.done.wait [#allocation4], 128  }
 0x24a   :  { %280 = vsyncadd [#allocation4], 4294967168 }
 0x24b   :  { %182 = vsyncpa [#allocation3], 1 }
 0x24c   :  { %183 = vsyncpa [#allocation6], 1 }
 0x24d   :  { %184 = vsyncpa [#allocation4], 1 }

</bundles_post_ra>
